<compile_context>
chip_gen: v7x
topology: tpu7x:2x2x1
jax: 0.10.0
libtpu: 0.0.40
codegen_flags: <defaults>
</compile_context>

<pallas_src>
import functools
import math

import jax
import jax.numpy as jnp
from jax.experimental import pallas as pl
from jax.experimental.pallas import tpu as pltpu


def _round_up(x, m):
    return ((x + m - 1) // m) * m


def _vmem_budget_bytes():
    # Physical VMEM differs per generation (v5e/v6e: 128 MiB, v7x: 64 MiB/TC).
    cap = 64 * 1024 * 1024                      # conservative fallback
    try:
        info = pltpu.get_tpu_info()
        cap = int(getattr(info, "vmem_capacity_bytes", cap))
    except Exception:
        pass
    return (cap * 3) // 4                       # ~25% headroom


def _soft_triple_epilogue(sim, labels, *, real_classes, padded_classes,
                          centers_per_class, la, gamma_inv, margin):
    """sim: (tb, M*C_pad) f32, centers-major (column = m*C_pad + c).
    labels: (tb, 1) int32.  Returns per-row loss (tb, 1) f32."""
    C = padded_classes
    M = centers_per_class

    # Per-class max over the M centers: M dense, lane-wide (tb, C) passes.
    smax = sim[:, 0:C]
    for m in range(1, M):
        smax = jnp.maximum(smax, sim[:, m * C:(m + 1) * C])

    # Per-class softmax over centers + weighted similarity (M unrolled passes).
    denom = jnp.zeros_like(smax)
    numer = jnp.zeros_like(smax)
    for m in range(M):
        s_m = sim[:, m * C:(m + 1) * C]
        e_m = jnp.exp((s_m - smax) * gamma_inv)
        denom += e_m
        numer += e_m * s_m
    # EUP approx reciprocal frees VALU slots in this exp-heavy epilogue.
    sim_to_classes = numer * pl.reciprocal(denom, approx=True)      # (tb, C)

    tb = sim_to_classes.shape[0]
    classes = jax.lax.broadcasted_iota(jnp.int32, (tb, C), 1)
    onehot = (classes == labels).astype(jnp.float32)                # (tb, C)

    logits = la * (sim_to_classes - margin * onehot)
    if padded_classes != real_classes:
        # Mask the lane-padding classes out of the logsumexp.
        logits = jnp.where(classes < real_classes, logits, jnp.float32(-1e30))

    lmax = jnp.max(logits, axis=1, keepdims=True)
    lse = lmax + jnp.log(jnp.sum(jnp.exp(logits - lmax), axis=1, keepdims=True))
    label_logit = jnp.sum(logits * onehot, axis=1, keepdims=True)
    return lse - label_logit                                        # (tb, 1)


def _kernel_resident(x_ref, fc_ref, xinv_ref, lab_ref, o_ref, *, real_classes,
                     padded_classes, centers_per_class, la, gamma_inv, margin):
    """grid = (batch_tiles,); pre-normalized centers-major fc is VMEM-resident."""
    acc = jnp.dot(x_ref[...], fc_ref[...], preferred_element_type=jnp.float32)
    sim = acc * xinv_ref[...]
    o_ref[...] = _soft_triple_epilogue(
        sim, lab_ref[...], real_classes=real_classes,
        padded_classes=padded_classes, centers_per_class=centers_per_class,
        la=la, gamma_inv=gamma_inv, margin=margin)


def _kernel_tiled(x_ref, fc_ref, xinv_ref, lab_ref, o_ref, acc_ref, *,
                  real_classes, padded_classes, centers_per_class, la,
                  gamma_inv, margin):
    """grid = (batch_tiles, d_tiles); fc streamed over D with an f32 accumulator."""
    k = pl.program_id(1)

    @pl.when(k == 0)
    def _():
        acc_ref[...] = jnp.zeros_like(acc_ref)

    acc_ref[...] += jnp.dot(x_ref[...], fc_ref[...],
                            preferred_element_type=jnp.float32)

    @pl.when(k == pl.num_programs(1) - 1)
    def _():
        sim = acc_ref[...] * xinv_ref[...]
        o_ref[...] = _soft_triple_epilogue(
            sim, lab_ref[...], real_classes=real_classes,
            padded_classes=padded_classes, centers_per_class=centers_per_class,
            la=la, gamma_inv=gamma_inv, margin=margin)


def soft_triple_loss_angle(x, labels, fc, *, nb_classes, centers_per_class=10,
                           la=20.0, gamma=0.1, margin=0.01,
                           block_b=256, block_d=512, mxu_dtype=jnp.bfloat16):
    """x: (B, D) float; labels: (B,) int; fc: (D, nb_classes*centers_per_class)."""
    B, D = x.shape
    C, M = int(nb_classes), int(centers_per_class)
    assert fc.shape == (D, C * M)

    x = x.astype(jnp.float32)
    fc = fc.astype(jnp.float32)
    labels2 = labels.astype(jnp.int32).reshape(B, 1)

    # Exact f32 inverse row norms of X (tiny wrapper reduction); keeps the
    # normalization exact even though the MXU inputs are bf16.
    xinv = jax.lax.rsqrt(jnp.maximum(jnp.sum(x * x, axis=1, keepdims=True), 1e-24))

    # Lane-dense class padding only when C is large enough to matter.
    C_pad = _round_up(C, 128) if (C >= 64 and C % 128 != 0) else C
    CM = C_pad * M

    # Centers-major re-layout (column = m*C_pad + c) with the inverse column
    # norms of fc folded in (each column becomes unit L2 norm, in f32).
    fc3 = fc.reshape(D, C, M)
    winv = jax.lax.rsqrt(jnp.maximum(jnp.sum(fc3 * fc3, axis=0, keepdims=True),
                                     1e-24))
    fc3 = fc3 * winv
    if C_pad != C:
        fc3 = jnp.pad(fc3, ((0, 0), (0, C_pad - C), (0, 0)))
    fc_perm = fc3.transpose(0, 2, 1).reshape(D, CM)

    itemsize = jnp.dtype(mxu_dtype).itemsize
    budget = _vmem_budget_bytes()

    # --- Batch tiling (always "parallel"). ---
    tb = min(int(block_b), _round_up(B, 8))
    b_pad = _round_up(B, tb)
    nb = b_pad // tb

    kern_kwargs = dict(real_classes=C, padded_classes=C_pad,
                       centers_per_class=M, la=float(la),
                       gamma_inv=1.0 / float(gamma), margin=float(margin))

    def _resident_vmem(tb_, d_):
        fc_b = 2 * d_ * CM * itemsize          # conservatively double-buffered
        x_b = 2 * tb_ * d_ * itemsize
        epi_b = tb_ * CM * 4 + 8 * tb_ * C_pad * 4
        return fc_b + x_b + epi_b + 64 * tb_ + 4096

    if _resident_vmem(tb, D) <= budget:
        # --- fc fits in VMEM: load once (constant block index), no D loop. ---
        # Split the batch into >= 2 tiles when possible so both v7x TensorCores
        # get work; free on single-TC chips since fc is not re-fetched.
        if nb == 1 and tb >= 16 and _resident_vmem(_round_up(tb // 2, 8), D) <= budget:
            tb = _round_up(tb // 2, 8)
            b_pad = _round_up(B, tb)
            nb = b_pad // tb

        x_p, lab_p, xinv_p = x, labels2, xinv
        if b_pad != B:
            pad = b_pad - B
            x_p = jnp.pad(x_p, ((0, pad), (0, 0)))
            lab_p = jnp.pad(lab_p, ((0, pad), (0, 0)))
            xinv_p = jnp.pad(xinv_p, ((0, pad), (0, 0)))
        x_p = x_p.astype(mxu_dtype)
        fc_p = fc_perm.astype(mxu_dtype)

        cost = pl.CostEstimate(
            flops=2 * b_pad * D * CM,
            transcendentals=b_pad * (CM + C_pad),
            bytes_accessed=itemsize * (b_pad * D + D * CM) + 4 * 3 * b_pad)

        losses = pl.pallas_call(
            functools.partial(_kernel_resident, **kern_kwargs),
            out_shape=jax.ShapeDtypeStruct((b_pad, 1), jnp.float32),
            grid_spec=pltpu.PrefetchScalarGridSpec(
                num_scalar_prefetch=0,
                grid=(nb,),
                in_specs=[
                    pl.BlockSpec((tb, D), lambda i: (i, 0)),   # x tile (bf16)
                    pl.BlockSpec((D, CM), lambda i: (0, 0)),   # fc, VMEM-resident
                    pl.BlockSpec((tb, 1), lambda i: (i, 0)),   # 1/||x|| (f32)
                    pl.BlockSpec((tb, 1), lambda i: (i, 0)),   # labels (int32)
                ],
                out_specs=pl.BlockSpec((tb, 1), lambda i: (i, 0))),
            compiler_params=pltpu.CompilerParams(
                dimension_semantics=("parallel",),
                vmem_limit_bytes=budget),
            cost_estimate=cost,
        )(x_p, fc_p, xinv_p, lab_p)
    else:
        # --- fc does not fit: stream it over D tiles, f32 sim accumulator. ---
        # TODO(synk): if even one (tb, CM) f32 accumulator does not fit, tile
        # the class axis with an online (flash-style) logsumexp.
        tk = 128
        while tk * 2 <= min(int(block_d), D):
            tk *= 2

        def _tiled_vmem(tb_, tk_):
            return (2 * tb_ * tk_ * itemsize + 2 * tk_ * CM * itemsize
                    + tb_ * CM * 4 + 8 * tb_ * C_pad * 4 + 64 * tb_ + 4096)

        while tk > 128 and _tiled_vmem(tb, tk) > budget:
            tk //= 2
        while tb > 8 and _tiled_vmem(tb, tk) > budget:
            tb = max(8, _round_up(tb // 2, 8))
        b_pad = _round_up(B, tb)
        nb = b_pad // tb
        d_pad = _round_up(D, tk)
        nk = d_pad // tk

        x_p, lab_p, xinv_p, fc_p = x, labels2, xinv, fc_perm
        if b_pad != B:
            pad = b_pad - B
            x_p = jnp.pad(x_p, ((0, pad), (0, 0)))
            lab_p = jnp.pad(lab_p, ((0, pad), (0, 0)))
            xinv_p = jnp.pad(xinv_p, ((0, pad), (0, 0)))
        if d_pad != D:
            x_p = jnp.pad(x_p, ((0, 0), (0, d_pad - D)))
            fc_p = jnp.pad(fc_p, ((0, d_pad - D), (0, 0)))
        x_p = x_p.astype(mxu_dtype)
        fc_p = fc_p.astype(mxu_dtype)

        cost = pl.CostEstimate(
            flops=2 * b_pad * d_pad * CM,
            transcendentals=b_pad * (CM + C_pad),
            bytes_accessed=itemsize * (b_pad * d_pad + nb * d_pad * CM)
                           + 4 * 3 * b_pad)

        losses = pl.pallas_call(
            functools.partial(_kernel_tiled, **kern_kwargs),
            out_shape=jax.ShapeDtypeStruct((b_pad, 1), jnp.float32),
            grid_spec=pltpu.PrefetchScalarGridSpec(
                num_scalar_prefetch=0,
                grid=(nb, nk),
                in_specs=[
                    pl.BlockSpec((tb, tk), lambda i, k: (i, k)),   # x
                    pl.BlockSpec((tk, CM), lambda i, k: (k, 0)),   # fc
                    pl.BlockSpec((tb, 1), lambda i, k: (i, 0)),    # 1/||x||
                    pl.BlockSpec((tb, 1), lambda i, k: (i, 0)),    # labels
                ],
                out_specs=pl.BlockSpec((tb, 1), lambda i, k: (i, 0)),
                scratch_shapes=[pltpu.VMEM((tb, CM), jnp.float32)]),
            compiler_params=pltpu.CompilerParams(
                dimension_semantics=("parallel", "arbitrary"),
                vmem_limit_bytes=budget),
            cost_estimate=cost,
        )(x_p, fc_p, xinv_p, lab_p)

    # Final mean over the real (unpadded) batch rows.
    return jnp.mean(losses[:B, 0])


def _reference(x, labels, fc, *, nb_classes, centers_per_class, la, gamma, margin):
    eps = 1e-12
    xn = x / jnp.maximum(jnp.linalg.norm(x, axis=1, keepdims=True), eps)
    wn = fc / jnp.maximum(jnp.linalg.norm(fc, axis=0, keepdims=True), eps)
    sim = (xn @ wn).reshape(x.shape[0], nb_classes, centers_per_class)
    prob = jax.nn.softmax(sim * (1.0 / gamma), axis=2)
    simcls = jnp.sum(prob * sim, axis=2)
    onehot = jax.nn.one_hot(labels, nb_classes, dtype=jnp.float32)
    logits = la * (simcls - margin * onehot)
    lse = jax.scipy.special.logsumexp(logits, axis=1)
    return jnp.mean(lse - jnp.sum(logits * onehot, axis=1))


if __name__ == "__main__":
    # Module hyper-parameters (small, consistent with __init__ signature).
    nb_classes = 4
    sz_embed = 32
    centers_per_class = 10
    la, gamma, margin = 20.0, 0.1, 0.01
    B = 8

    key = jax.random.PRNGKey(0)
    kx, kt, kw = jax.random.split(key, 3)

    # Inputs: embeddings X (B, sz_embed) and integer labels T (B,).
    X = jax.random.normal(kx, (B, sz_embed), dtype=jnp.float32)
    T = jax.random.randint(kt, (B,), 0, nb_classes, dtype=jnp.int32)

    # Parameter fc: kaiming_uniform_(a=sqrt(5)) on shape (sz_embed, C*M)
    # -> uniform(-1/sqrt(fan_in), 1/sqrt(fan_in)) with fan_in = C*M.
    fan_in = nb_classes * centers_per_class
    bound = 1.0 / math.sqrt(fan_in)
    fc = jax.random.uniform(kw, (sz_embed, nb_classes * centers_per_class),
                            minval=-bound, maxval=bound, dtype=jnp.float32)

    loss = soft_triple_loss_angle(
        X, T, fc,
        nb_classes=nb_classes, centers_per_class=centers_per_class,
        la=la, gamma=gamma, margin=margin)
    loss = jax.block_until_ready(loss)

    ref = _reference(X, T, fc, nb_classes=nb_classes,
                     centers_per_class=centers_per_class,
                     la=la, gamma=gamma, margin=margin)
    # MXU inputs are bf16 (f32 accumulation / f32 epilogue); tolerance reflects
    # bf16 input rounding amplified by la=20.
    assert jnp.allclose(loss, ref, rtol=3e-2, atol=3e-2), (loss, ref)

    print("KERNEL_OK")
</pallas_src>

<mosaic_0001>
module attributes {stable_mosaic.version = 11 : i64} {
  func.func @_kernel_resident(%arg0: i32, %arg1: memref<8x32xbf16, #tpu.memory_space<vmem>>, %arg2: memref<32x40xbf16, #tpu.memory_space<vmem>>, %arg3: memref<8x1xf32, #tpu.memory_space<vmem>>, %arg4: memref<8x1xi32, #tpu.memory_space<vmem>>, %arg5: memref<8x1xf32, #tpu.memory_space<vmem>>) attributes {dimension_semantics = [#tpu.dimension_semantics<parallel>], iteration_bounds = array<i64: 1>, scalar_prefetch = 0 : i64, scratch_operands = 0 : i64, tpu.core_type = #tpu.core_type<tc>, window_params = [{transform_indices = @transform_0, window_bounds = array<i64: 8, 32>}, {pipeline_mode = #tpu.pipeline_mode<synchronous>, transform_indices = @transform_1, window_bounds = array<i64: 32, 40>}, {transform_indices = @transform_2, window_bounds = array<i64: 8, 1>}, {transform_indices = @transform_3, window_bounds = array<i64: 8, 1>}, {transform_indices = @transform_4, window_bounds = array<i64: 8, 1>}]} {
    %c0 = arith.constant 0 : index
    %c0_0 = arith.constant 0 : index
    %0 = vector.load %arg1[%c0, %c0_0] : memref<8x32xbf16, #tpu.memory_space<vmem>>, vector<8x32xbf16>
    %c0_1 = arith.constant 0 : index
    %c0_2 = arith.constant 0 : index
    %1 = vector.load %arg2[%c0_1, %c0_2] : memref<32x40xbf16, #tpu.memory_space<vmem>>, vector<32x40xbf16>
    %cst = arith.constant dense<0.000000e+00> : vector<8x40xf32>
    %2 = tpu.matmul %0, %1, %cst {dimension_numbers = #tpu.dot_dimension_numbers<[1], [0], [0], [1], [0, 0, 1, 1], [], []>} : vector<8x32xbf16>, vector<32x40xbf16>, vector<8x40xf32> -> vector<8x40xf32>
    %c0_3 = arith.constant 0 : index
    %c0_4 = arith.constant 0 : index
    %3 = vector.load %arg3[%c0_3, %c0_4] : memref<8x1xf32, #tpu.memory_space<vmem>>, vector<8x1xf32>
    %4 = vector.broadcast %3 : vector<8x1xf32> to vector<8x40xf32>
    %5 = arith.mulf %2, %4 : vector<8x40xf32>
    %c0_5 = arith.constant 0 : index
    %c0_6 = arith.constant 0 : index
    %6 = vector.load %arg4[%c0_5, %c0_6] : memref<8x1xi32, #tpu.memory_space<vmem>>, vector<8x1xi32>
    %7 = vector.extract_strided_slice %5 {offsets = [0, 0], sizes = [8, 4], strides = [1, 1]} : vector<8x40xf32> to vector<8x4xf32>
    %8 = vector.extract_strided_slice %5 {offsets = [0, 4], sizes = [8, 4], strides = [1, 1]} : vector<8x40xf32> to vector<8x4xf32>
    %9 = arith.maximumf %7, %8 : vector<8x4xf32>
    %10 = vector.extract_strided_slice %5 {offsets = [0, 8], sizes = [8, 4], strides = [1, 1]} : vector<8x40xf32> to vector<8x4xf32>
    %11 = arith.maximumf %9, %10 : vector<8x4xf32>
    %12 = vector.extract_strided_slice %5 {offsets = [0, 12], sizes = [8, 4], strides = [1, 1]} : vector<8x40xf32> to vector<8x4xf32>
    %13 = arith.maximumf %11, %12 : vector<8x4xf32>
    %14 = vector.extract_strided_slice %5 {offsets = [0, 16], sizes = [8, 4], strides = [1, 1]} : vector<8x40xf32> to vector<8x4xf32>
    %15 = arith.maximumf %13, %14 : vector<8x4xf32>
    %16 = vector.extract_strided_slice %5 {offsets = [0, 20], sizes = [8, 4], strides = [1, 1]} : vector<8x40xf32> to vector<8x4xf32>
    %17 = arith.maximumf %15, %16 : vector<8x4xf32>
    %18 = vector.extract_strided_slice %5 {offsets = [0, 24], sizes = [8, 4], strides = [1, 1]} : vector<8x40xf32> to vector<8x4xf32>
    %19 = arith.maximumf %17, %18 : vector<8x4xf32>
    %20 = vector.extract_strided_slice %5 {offsets = [0, 28], sizes = [8, 4], strides = [1, 1]} : vector<8x40xf32> to vector<8x4xf32>
    %21 = arith.maximumf %19, %20 : vector<8x4xf32>
    %22 = vector.extract_strided_slice %5 {offsets = [0, 32], sizes = [8, 4], strides = [1, 1]} : vector<8x40xf32> to vector<8x4xf32>
    %23 = arith.maximumf %21, %22 : vector<8x4xf32>
    %24 = vector.extract_strided_slice %5 {offsets = [0, 36], sizes = [8, 4], strides = [1, 1]} : vector<8x40xf32> to vector<8x4xf32>
    %25 = arith.maximumf %23, %24 : vector<8x4xf32>
    %cst_7 = arith.constant 0.000000e+00 : f32
    %26 = vector.broadcast %cst_7 : f32 to vector<8x4xf32>
    %cst_8 = arith.constant 0.000000e+00 : f32
    %27 = vector.broadcast %cst_8 : f32 to vector<8x4xf32>
    %28 = vector.extract_strided_slice %5 {offsets = [0, 0], sizes = [8, 4], strides = [1, 1]} : vector<8x40xf32> to vector<8x4xf32>
    %29 = arith.subf %28, %25 : vector<8x4xf32>
    %cst_9 = arith.constant 1.000000e+01 : f32
    %30 = vector.broadcast %cst_9 : f32 to vector<8x4xf32>
    %31 = arith.mulf %29, %30 : vector<8x4xf32>
    %32 = math.exp %31 : vector<8x4xf32>
    %33 = arith.addf %26, %32 : vector<8x4xf32>
    %34 = arith.mulf %32, %28 : vector<8x4xf32>
    %35 = arith.addf %27, %34 : vector<8x4xf32>
    %36 = vector.extract_strided_slice %5 {offsets = [0, 4], sizes = [8, 4], strides = [1, 1]} : vector<8x40xf32> to vector<8x4xf32>
    %37 = arith.subf %36, %25 : vector<8x4xf32>
    %cst_10 = arith.constant 1.000000e+01 : f32
    %38 = vector.broadcast %cst_10 : f32 to vector<8x4xf32>
    %39 = arith.mulf %37, %38 : vector<8x4xf32>
    %40 = math.exp %39 : vector<8x4xf32>
    %41 = arith.addf %33, %40 : vector<8x4xf32>
    %42 = arith.mulf %40, %36 : vector<8x4xf32>
    %43 = arith.addf %35, %42 : vector<8x4xf32>
    %44 = vector.extract_strided_slice %5 {offsets = [0, 8], sizes = [8, 4], strides = [1, 1]} : vector<8x40xf32> to vector<8x4xf32>
    %45 = arith.subf %44, %25 : vector<8x4xf32>
    %cst_11 = arith.constant 1.000000e+01 : f32
    %46 = vector.broadcast %cst_11 : f32 to vector<8x4xf32>
    %47 = arith.mulf %45, %46 : vector<8x4xf32>
    %48 = math.exp %47 : vector<8x4xf32>
    %49 = arith.addf %41, %48 : vector<8x4xf32>
    %50 = arith.mulf %48, %44 : vector<8x4xf32>
    %51 = arith.addf %43, %50 : vector<8x4xf32>
    %52 = vector.extract_strided_slice %5 {offsets = [0, 12], sizes = [8, 4], strides = [1, 1]} : vector<8x40xf32> to vector<8x4xf32>
    %53 = arith.subf %52, %25 : vector<8x4xf32>
    %cst_12 = arith.constant 1.000000e+01 : f32
    %54 = vector.broadcast %cst_12 : f32 to vector<8x4xf32>
    %55 = arith.mulf %53, %54 : vector<8x4xf32>
    %56 = math.exp %55 : vector<8x4xf32>
    %57 = arith.addf %49, %56 : vector<8x4xf32>
    %58 = arith.mulf %56, %52 : vector<8x4xf32>
    %59 = arith.addf %51, %58 : vector<8x4xf32>
    %60 = vector.extract_strided_slice %5 {offsets = [0, 16], sizes = [8, 4], strides = [1, 1]} : vector<8x40xf32> to vector<8x4xf32>
    %61 = arith.subf %60, %25 : vector<8x4xf32>
    %cst_13 = arith.constant 1.000000e+01 : f32
    %62 = vector.broadcast %cst_13 : f32 to vector<8x4xf32>
    %63 = arith.mulf %61, %62 : vector<8x4xf32>
    %64 = math.exp %63 : vector<8x4xf32>
    %65 = arith.addf %57, %64 : vector<8x4xf32>
    %66 = arith.mulf %64, %60 : vector<8x4xf32>
    %67 = arith.addf %59, %66 : vector<8x4xf32>
    %68 = vector.extract_strided_slice %5 {offsets = [0, 20], sizes = [8, 4], strides = [1, 1]} : vector<8x40xf32> to vector<8x4xf32>
    %69 = arith.subf %68, %25 : vector<8x4xf32>
    %cst_14 = arith.constant 1.000000e+01 : f32
    %70 = vector.broadcast %cst_14 : f32 to vector<8x4xf32>
    %71 = arith.mulf %69, %70 : vector<8x4xf32>
    %72 = math.exp %71 : vector<8x4xf32>
    %73 = arith.addf %65, %72 : vector<8x4xf32>
    %74 = arith.mulf %72, %68 : vector<8x4xf32>
    %75 = arith.addf %67, %74 : vector<8x4xf32>
    %76 = vector.extract_strided_slice %5 {offsets = [0, 24], sizes = [8, 4], strides = [1, 1]} : vector<8x40xf32> to vector<8x4xf32>
    %77 = arith.subf %76, %25 : vector<8x4xf32>
    %cst_15 = arith.constant 1.000000e+01 : f32
    %78 = vector.broadcast %cst_15 : f32 to vector<8x4xf32>
    %79 = arith.mulf %77, %78 : vector<8x4xf32>
    %80 = math.exp %79 : vector<8x4xf32>
    %81 = arith.addf %73, %80 : vector<8x4xf32>
    %82 = arith.mulf %80, %76 : vector<8x4xf32>
    %83 = arith.addf %75, %82 : vector<8x4xf32>
    %84 = vector.extract_strided_slice %5 {offsets = [0, 28], sizes = [8, 4], strides = [1, 1]} : vector<8x40xf32> to vector<8x4xf32>
    %85 = arith.subf %84, %25 : vector<8x4xf32>
    %cst_16 = arith.constant 1.000000e+01 : f32
    %86 = vector.broadcast %cst_16 : f32 to vector<8x4xf32>
    %87 = arith.mulf %85, %86 : vector<8x4xf32>
    %88 = math.exp %87 : vector<8x4xf32>
    %89 = arith.addf %81, %88 : vector<8x4xf32>
    %90 = arith.mulf %88, %84 : vector<8x4xf32>
    %91 = arith.addf %83, %90 : vector<8x4xf32>
    %92 = vector.extract_strided_slice %5 {offsets = [0, 32], sizes = [8, 4], strides = [1, 1]} : vector<8x40xf32> to vector<8x4xf32>
    %93 = arith.subf %92, %25 : vector<8x4xf32>
    %cst_17 = arith.constant 1.000000e+01 : f32
    %94 = vector.broadcast %cst_17 : f32 to vector<8x4xf32>
    %95 = arith.mulf %93, %94 : vector<8x4xf32>
    %96 = math.exp %95 : vector<8x4xf32>
    %97 = arith.addf %89, %96 : vector<8x4xf32>
    %98 = arith.mulf %96, %92 : vector<8x4xf32>
    %99 = arith.addf %91, %98 : vector<8x4xf32>
    %100 = vector.extract_strided_slice %5 {offsets = [0, 36], sizes = [8, 4], strides = [1, 1]} : vector<8x40xf32> to vector<8x4xf32>
    %101 = arith.subf %100, %25 : vector<8x4xf32>
    %cst_18 = arith.constant 1.000000e+01 : f32
    %102 = vector.broadcast %cst_18 : f32 to vector<8x4xf32>
    %103 = arith.mulf %101, %102 : vector<8x4xf32>
    %104 = math.exp %103 : vector<8x4xf32>
    %105 = arith.addf %97, %104 : vector<8x4xf32>
    %106 = arith.mulf %104, %100 : vector<8x4xf32>
    %107 = arith.addf %99, %106 : vector<8x4xf32>
    %108 = tpu.reciprocal %105 {approx = true} : vector<8x4xf32> -> vector<8x4xf32>
    %109 = arith.mulf %107, %108 : vector<8x4xf32>
    %110 = tpu.iota {dimensions = array<i32: 1>} : vector<8x4xi32>
    %111 = vector.broadcast %6 : vector<8x1xi32> to vector<8x4xi32>
    %112 = arith.cmpi eq, %110, %111 : vector<8x4xi32>
    %113 = arith.extui %112 : vector<8x4xi1> to vector<8x4xi32>
    %114 = arith.sitofp %113 : vector<8x4xi32> to vector<8x4xf32>
    %cst_19 = arith.constant 0.00999999977 : f32
    %115 = vector.broadcast %cst_19 : f32 to vector<8x4xf32>
    %116 = arith.mulf %115, %114 : vector<8x4xf32>
    %117 = arith.subf %109, %116 : vector<8x4xf32>
    %cst_20 = arith.constant 2.000000e+01 : f32
    %118 = vector.broadcast %cst_20 : f32 to vector<8x4xf32>
    %119 = arith.mulf %118, %117 : vector<8x4xf32>
    %cst_21 = arith.constant dense<0xFF800000> : vector<8xf32>
    %120 = vector.multi_reduction <maximumf>, %119, %cst_21 [1] : vector<8x4xf32> to vector<8xf32>
    %121 = vector.shape_cast %120 : vector<8xf32> to vector<8x1xf32>
    %122 = vector.broadcast %121 : vector<8x1xf32> to vector<8x4xf32>
    %123 = arith.subf %119, %122 : vector<8x4xf32>
    %124 = math.exp %123 : vector<8x4xf32>
    %cst_22 = arith.constant dense<0.000000e+00> : vector<8xf32>
    %125 = vector.multi_reduction <add>, %124, %cst_22 [1] : vector<8x4xf32> to vector<8xf32>
    %126 = vector.shape_cast %125 : vector<8xf32> to vector<8x1xf32>
    %127 = math.log %126 : vector<8x1xf32>
    %128 = arith.addf %121, %127 : vector<8x1xf32>
    %129 = arith.mulf %119, %114 : vector<8x4xf32>
    %cst_23 = arith.constant dense<0.000000e+00> : vector<8xf32>
    %130 = vector.multi_reduction <add>, %129, %cst_23 [1] : vector<8x4xf32> to vector<8xf32>
    %131 = vector.shape_cast %130 : vector<8xf32> to vector<8x1xf32>
    %132 = arith.subf %128, %131 : vector<8x1xf32>
    %c0_24 = arith.constant 0 : index
    %c0_25 = arith.constant 0 : index
    %133 = vector.load %arg5[%c0_24, %c0_25] : memref<8x1xf32, #tpu.memory_space<vmem>>, vector<8x1xf32>
    tpu.vector_store %arg5[%c0_24, %c0_25], %132 {strides = array<i32>} : memref<8x1xf32, #tpu.memory_space<vmem>>, vector<8x1xf32>,
    return
  }
  func.func @transform_0(%arg0: i32) -> (i32, i32) {
    %c0_i32 = arith.constant 0 : i32
    %c0_i32_0 = arith.constant 0 : i32
    return %arg0, %c0_i32 : i32, i32
  }
  func.func @transform_1(%arg0: i32) -> (i32, i32) {
    %c0_i32 = arith.constant 0 : i32
    %c0_i32_0 = arith.constant 0 : i32
    %c0_i32_1 = arith.constant 0 : i32
    return %c0_i32, %c0_i32_0 : i32, i32
  }
  func.func @transform_2(%arg0: i32) -> (i32, i32) {
    %c0_i32 = arith.constant 0 : i32
    %c0_i32_0 = arith.constant 0 : i32
    return %arg0, %c0_i32 : i32, i32
  }
  func.func @transform_3(%arg0: i32) -> (i32, i32) {
    %c0_i32 = arith.constant 0 : i32
    %c0_i32_0 = arith.constant 0 : i32
    return %arg0, %c0_i32 : i32, i32
  }
  func.func @transform_4(%arg0: i32) -> (i32, i32) {
    %c0_i32 = arith.constant 0 : i32
    %c0_i32_0 = arith.constant 0 : i32
    return %arg0, %c0_i32 : i32, i32
  }
}

</mosaic_0001>

<bundles_post_ra>
// kernel: tpu_custom_call.1
= control target key start
LH: loop header
LB: loop body
LE: loop exit
PB: predicated region body
PF: predicated region fallthrough
CT: control target
= control target key end

     0   :  { %v397_v0 = vmov 0.0   ;;  %vm398_vm0 = vmmov 0   ;;  %v399_v2 = vmov 0   ;;  %vm35_vm1 = vcmask 261120   ;;  %s402_s23 = smov 116   ;;  %s404_s24 = smov 108   ;;  %s536_s1 = inlined_call_operand.vmem [shape: bf16[32,40], index: 1, kind: input, shape index: {}]   ;;  %s537_s2 = inlined_call_operand.vmem [shape: f32[8,1], index: 2, kind: input, shape index: {}]   ;;  %s538_s0 = inlined_call_operand.vmem [shape: bf16[8,32], index: 0, kind: input, shape index: {}]   ;;  %s539_s3 = inlined_call_operand.vmem [shape: s32[8,1], index: 3, kind: input, shape index: {}]   ;;  %s540_s4 = inlined_call_operand.vmem [shape: f32[8,1], index: 4, kind: output, shape index: {}]  }
   0x1   :  { %338 = vmatprep.subr.bf16.mxu0 %v397_v0  ;;  %v369_v1 = vld [vmem:[%s536_s1] sm:$0xff]   ;;  %342 = vmatprep.mubr.msk.bf16.mxu0 %vm398_vm0, %v397_v0  ;;  %v370_v3 = vld [vmem:[%s536_s1 + $0x8] sm:$0xff]   ;;  %s400_s1 = smov 120   ;;  %s405_s25 = smov 104   ;;  %vm307_vm3 = vcmask 31744   ;;  %vm325_vm4 = vcmask 7168  }
   0x2   :  { %367 = vset.pattern.permute.xlu0 %v399_v2  ;;  %368 = vset.pattern.permute.xlu1 %v399_v2  ;;  %v79_v4 = vld [vmem:[%s537_s2] sm:$0xff]  ;;  %s401_s2 = smov 124   ;;  %s406_s26 = smov 100  }
   0x3   :  { %339 = vmatpush3.bf16.msra.mxu0 %v369_v1  ;;  %82 = vperm.xlu0 %367, %v79_v4   ;;  %v18_v5 = vld [vmem:[%s538_s0] sm:$0xf]  ;;  %s403_s0 = smov 112   ;;  %s407_s27 = smov 96  }
   0x4   :  { %340 = vmatprep.subr.bf16.mxu0 %v397_v0  ;;  %s408_s28 = smov 92   ;;  %s409_s29 = smov 8  }
   0x5   :  { %s410_s30 = smov 4   ;;  %s411_s5 = smov 16  }
   0x6   :  { %s412_s6 = smov 12   ;;  %s413_s7 = smov 24  }
   0x7   :  { %341 = vmatpush3.bf16.msra.mxu0 %v370_v3  ;;  %s414_s8 = smov 20   ;;  %s415_s9 = smov 32  }
   0x8   :  { %s416_s10 = smov 28   ;;  %s417_s11 = smov 36  }
   0xa   :  { %343 = vmatmul.mubr.msk.bf16.vlgmr.msra.gmra.mrb[0].mxu0 %vm35_vm1, %v18_v5 }
  0x82   :  { %v83_v6 = vpop.permute.xlu0 %82 }
  0xdd   :  { %v73_v7 = vpop.f32.mrb[0].mxu0 }
  0xde   :  { %v458_v8 = vmul.f32 %v83_v6, %v73_v7  ;;  %v344_v9 = vpop.f32.mrb[1].mxu0 }
  0xdf   :  { %v76_v10 = vpop.f32.mrb[2].mxu0 }
  0xe0   :  { %92 = vrot.lane.b32.xlu1 %v458_v8, %s400_s1  ;;  %88 = vrot.lane.b32.xlu0 %v458_v8, %s401_s2  ;;  %v345_v11 = vpop.f32.mrb[3].mxu0 }
  0xe4   :  { %96 = vrot.lane.b32.xlu1 %v458_v8, %s402_s23  ;;  %100 = vrot.lane.b32.xlu0 %v458_v8, %s403_s0 }
  0xe8   :  { %104 = vrot.lane.b32.xlu1 %v458_v8, %s404_s24  ;;  %108 = vrot.lane.b32.xlu0 %v458_v8, %s405_s25 }
  0xec   :  { %112 = vrot.lane.b32.xlu1 %v458_v8, %s406_s26  ;;  %116 = vrot.lane.b32.xlu0 %v458_v8, %s407_s27 }
  0xf0   :  { %120 = vrot.lane.b32.xlu1 %v458_v8, %s408_s28 }
 0x152   :  { %v93_v12 = vpop.permute.xlu1 %92  ;;  %v89_v13 = vpop.permute.xlu0 %88 }
 0x153   :  { %v91_v14 = vmax.f32 %v458_v8, %v89_v13 }
 0x155   :  { %v95_v15 = vmax.f32 %v91_v14, %v93_v12 }
 0x156   :  { %v97_v16 = vpop.permute.xlu1 %96  ;;  %v101_v17 = vpop.permute.xlu0 %100 }
 0x157   :  { %v99_v18 = vmax.f32 %v95_v15, %v97_v16 }
 0x159   :  { %v103_v19 = vmax.f32 %v99_v18, %v101_v17  ;;  %v86_v18 = vld [vmem:[%s539_s3] sm:$0xff] }
 0x15a   :  { %v105_v20 = vpop.permute.xlu1 %104  ;;  %v109_v21 = vpop.permute.xlu0 %108 }
 0x15b   :  { %v107_v22 = vmax.f32 %v103_v19, %v105_v20 }
 0x15d   :  { %v111_v23 = vmax.f32 %v107_v22, %v109_v21 }
 0x15e   :  { %v113_v24 = vpop.permute.xlu1 %112  ;;  %v117_v26 = vpop.permute.xlu0 %116 }
 0x15f   :  { %v115_v25 = vmax.f32 %v111_v23, %v113_v24 }
 0x161   :  { %v119_v27 = vmax.f32 %v115_v25, %v117_v26 }
 0x162   :  { %v121_v28 = vpop.permute.xlu1 %120 }
 0x163   :  { %v479_v29 = vmax.f32 %v119_v27, %v121_v28 }
 0x165   :  { %150 = vrot.lane.b32.xlu1 %v479_v29, %s409_s29  ;;  %132 = vrot.lane.b32.xlu0 %v479_v29, %s410_s30  ;;  %v124_v23 = vsub.f32 %v458_v8, %v479_v29 }
 0x167   :  { %v125_v24 = vmul.f32 10.0, %v124_v23 }
 0x169   :  { %186 = vrot.lane.b32.xlu1 %v479_v29, %s411_s5  ;;  %168 = vrot.lane.b32.xlu0 %v479_v29, %s412_s6  ;;  %v126_v25 = vmul.f32 1.442695, %v125_v24 }
 0x16d   :  { %222 = vrot.lane.b32.xlu1 %v479_v29, %s413_s7  ;;  %204 = vrot.lane.b32.xlu0 %v479_v29, %s414_s8 }
 0x171   :  { %258 = vrot.lane.b32.xlu1 %v479_v29, %s415_s9  ;;  %240 = vrot.lane.b32.xlu0 %v479_v29, %s416_s10 }
 0x175   :  { %276 = vrot.lane.b32.xlu0 %v479_v29, %s417_s11 }
 0x1d7   :  { %v151_v30 = vpop.permute.xlu1 %150  ;;  %v133_v31 = vpop.permute.xlu0 %132 }
 0x1d8   :  { %v153_v32 = vsub.f32 %v458_v8, %v151_v30  ;;  %v135_v33 = vsub.f32 %v458_v8, %v133_v31 }
 0x1da   :  { %v154_v34 = vmul.f32 10.0, %v153_v32  ;;  %v136_v35 = vmul.f32 10.0, %v135_v33 }
 0x1db   :  { %v187_v36 = vpop.permute.xlu1 %186  ;;  %v169_v37 = vpop.permute.xlu0 %168 }
 0x1dc   :  { %v155_v38 = vmul.f32 1.442695, %v154_v34  ;;  %v137_v39 = vmul.f32 1.442695, %v136_v35  ;;  %v189_v40 = vsub.f32 %v458_v8, %v187_v36  ;;  %v171_v41 = vsub.f32 %v458_v8, %v169_v37 }
 0x1de   :  { %371 = vpow2.f32 %v155_v38  ;;  %v190_v42 = vmul.f32 10.0, %v189_v40  ;;  %v172_v43 = vmul.f32 10.0, %v171_v41 }
 0x1df   :  { %373 = vpow2.f32 %v137_v39  ;;  %v223_v44 = vpop.permute.xlu1 %222  ;;  %v205_v45 = vpop.permute.xlu0 %204 }
 0x1e0   :  { %v191_v46 = vmul.f32 1.442695, %v190_v42  ;;  %v173_v47 = vmul.f32 1.442695, %v172_v43  ;;  %v225_v48 = vsub.f32 %v458_v8, %v223_v44  ;;  %v207_v49 = vsub.f32 %v458_v8, %v205_v45 }
 0x1e2   :  { %375 = vpow2.f32 %v191_v46  ;;  %v226_v50 = vmul.f32 10.0, %v225_v48  ;;  %v208_v51 = vmul.f32 10.0, %v207_v49 }
 0x1e3   :  { %377 = vpow2.f32 %v173_v47  ;;  %v259_v52 = vpop.permute.xlu1 %258  ;;  %v241_v53 = vpop.permute.xlu0 %240 }
 0x1e4   :  { %v227_v54 = vmul.f32 1.442695, %v226_v50  ;;  %v209_v55 = vmul.f32 1.442695, %v208_v51  ;;  %v261_v56 = vsub.f32 %v458_v8, %v259_v52  ;;  %v243_v57 = vsub.f32 %v458_v8, %v241_v53 }
 0x1e6   :  { %379 = vpow2.f32 %v227_v54  ;;  %v244_v58 = vmul.f32 10.0, %v243_v57  ;;  %v262_v59 = vmul.f32 10.0, %v261_v56 }
 0x1e7   :  { %381 = vpow2.f32 %v209_v55  ;;  %v277_v60 = vpop.permute.xlu0 %276  ;;  %v296_v55 = vlaneseq }
 0x1e8   :  { %v372_v61 = vpop.eup %371  ;;  %v245_v62 = vmul.f32 1.442695, %v244_v58  ;;  %v279_v63 = vsub.f32 %v458_v8, %v277_v60  ;;  %v263_v2 = vmul.f32 1.442695, %v262_v59 }
 0x1e9   :  { %v374_v1 = vpop.eup %373  ;;  %158 = vrot.lane.b32.xlu0 %v372_v61, %s400_s1  ;;  %v162_v12 = vmul.f32 %v372_v61, %v458_v8  ;;  %v297_v59 = vand.u32 127, %v296_v55 }
 0x1ea   :  { %140 = vrot.lane.b32.xlu1 %v374_v1, %s401_s2  ;;  %383 = vpow2.f32 %v245_v62  ;;  %v280_v3 = vmul.f32 10.0, %v279_v63  ;;  %v144_v10 = vmul.f32 %v374_v1, %v458_v8 }
 0x1eb   :  { %385 = vpow2.f32 %v263_v2 }
 0x1ec   :  { %v376_v4 = vpop.eup %375  ;;  %v281_v6 = vmul.f32 1.442695, %v280_v3 }
 0x1ed   :  { %v378_v5 = vpop.eup %377  ;;  %194 = vrot.lane.b32.xlu0 %v376_v4, %s403_s0  ;;  %v198_v16 = vmul.f32 %v376_v4, %v458_v8 }
 0x1ee   :  { %176 = vrot.lane.b32.xlu1 %v378_v5, %s402_s23  ;;  %387 = vpow2.f32 %v281_v6  ;;  %v180_v14 = vmul.f32 %v378_v5, %v458_v8 }
 0x1ef   :  { %389 = vpow2.f32 %v126_v25 }
 0x1f0   :  { %v380_v7 = vpop.eup %379 }
 0x1f1   :  { %v382_v9 = vpop.eup %381  ;;  %230 = vrot.lane.b32.xlu0 %v380_v7, %s405_s25  ;;  %v234_v19 = vmul.f32 %v380_v7, %v458_v8 }
 0x1f2   :  { %212 = vrot.lane.b32.xlu1 %v382_v9, %s404_s24  ;;  %v216_v17 = vmul.f32 %v382_v9, %v458_v8 }
 0x1f4   :  { %v384_v11 = vpop.eup %383 }
 0x1f5   :  { %248 = vrot.lane.b32.xlu0 %v384_v11, %s406_s26  ;;  %v386_v13 = vpop.eup %385  ;;  %v252_v20 = vmul.f32 %v384_v11, %v458_v8 }
 0x1f6   :  { %146 = vrot.lane.b32.xlu1 %v144_v10, %s401_s2  ;;  %v270_v21 = vmul.f32 %v386_v13, %v458_v8 }
 0x1f8   :  { %v388_v15 = vpop.eup %387 }
 0x1f9   :  { %266 = vrot.lane.b32.xlu0 %v386_v13, %s407_s27  ;;  %v288_v22 = vmul.f32 %v388_v15, %v458_v8  ;;  %v390_v31 = vpop.eup %389 }
 0x1fa   :  { %164 = vrot.lane.b32.xlu1 %v162_v12, %s400_s1  ;;  %v129_v43 = vmul.f32 %v390_v31, %v458_v8 }
 0x1fd   :  { %284 = vrot.lane.b32.xlu0 %v388_v15, %s408_s28 }
 0x1fe   :  { %182 = vrot.lane.b32.xlu1 %v180_v14, %s402_s23 }
 0x201   :  { %218 = vrot.lane.b32.xlu0 %v216_v17, %s404_s24 }
 0x202   :  { %200 = vrot.lane.b32.xlu1 %v198_v16, %s403_s0 }
 0x205   :  { %236 = vrot.lane.b32.xlu0 %v234_v19, %s405_s25 }
 0x206   :  { %299 = vperm.xlu1 %368, %v86_v18  }
 0x209   :  { %272 = vrot.lane.b32.xlu0 %v270_v21, %s407_s27 }
 0x20a   :  { %254 = vrot.lane.b32.xlu1 %v252_v20, %s406_s26 }
 0x20e   :  { %290 = vrot.lane.b32.xlu1 %v288_v22, %s408_s28 }
 0x25b   :  { %v159_v26 = vpop.permute.xlu0 %158 }
 0x25c   :  { %v141_v27 = vpop.permute.xlu1 %140 }
 0x25d   :  { %v143_v32 = vadd.f32 %v390_v31, %v141_v27 }
 0x25f   :  { %v195_v30 = vpop.permute.xlu0 %194  ;;  %v161_v35 = vadd.f32 %v159_v26, %v143_v32 }
 0x260   :  { %v177_v28 = vpop.permute.xlu1 %176 }
 0x261   :  { %v179_v37 = vadd.f32 %v177_v28, %v161_v35 }
 0x263   :  { %v231_v34 = vpop.permute.xlu0 %230  ;;  %v197_v39 = vadd.f32 %v195_v30, %v179_v37 }
 0x264   :  { %v213_v33 = vpop.permute.xlu1 %212 }
 0x265   :  { %v215_v42 = vadd.f32 %v213_v33, %v197_v39 }
 0x267   :  { %v249_v38 = vpop.permute.xlu0 %248  ;;  %v233_v44 = vadd.f32 %v231_v34, %v215_v42 }
 0x268   :  { %v147_v36 = vpop.permute.xlu1 %146 }
 0x269   :  { %v149_v46 = vadd.f32 %v147_v36, %v129_v43  ;;  %v251_v48 = vadd.f32 %v249_v38, %v233_v44 }
 0x26b   :  { %v267_v41 = vpop.permute.xlu0 %266 }
 0x26c   :  { %v165_v40 = vpop.permute.xlu1 %164  ;;  %v269_v51 = vadd.f32 %v267_v41, %v251_v48 }
 0x26d   :  { %v167_v47 = vadd.f32 %v165_v40, %v149_v46 }
 0x26f   :  { %v285_v45 = vpop.permute.xlu0 %284 }
 0x270   :  { %v183_v29 = vpop.permute.xlu1 %182  ;;  %v287_v54 = vadd.f32 %v285_v45, %v269_v51 }
 0x271   :  { %v185_v50 = vadd.f32 %v183_v29, %v167_v47 }
 0x272   :  { %391 = vrcp.f32 %v287_v54 }
 0x273   :  { %v219_v52 = vpop.permute.xlu0 %218 }
 0x274   :  { %v201_v49 = vpop.permute.xlu1 %200 }
 0x275   :  { %v203_v53 = vadd.f32 %v201_v49, %v185_v50 }
 0x277   :  { %v221_v56 = vadd.f32 %v219_v52, %v203_v53  ;;  %v237_v57 = vpop.permute.xlu0 %236 }
 0x279   :  { %v239_v60 = vadd.f32 %v237_v57, %v221_v56 }
 0x27b   :  { %v273_v62 = vpop.permute.xlu0 %272 }
 0x27c   :  { %v392_v4 = vpop.eup %391 }
 0x285   :  { %v300_v58 = vpop.permute.xlu1 %299 }
 0x286   :  { %vm301_vm2 = vcmp.eq.s32.totalorder %v297_v59, %v300_v58 }
 0x287   :  { %v334_v1 = vsel %vm301_vm2, 1.0, %v397_v0 }
 0x288   :  { %v304_v5 = vmul.f32 0.01, %v334_v1 }
 0x289   :  { %v255_v61 = vpop.permute.xlu1 %254 }
 0x28a   :  { %v257_v8 = vadd.f32 %v255_v61, %v239_v60 }
 0x28c   :  { %v275_v63 = vadd.f32 %v273_v62, %v257_v8 }
 0x28d   :  { %v291_v2 = vpop.permute.xlu1 %290 }
 0x28e   :  { %v293_v3 = vadd.f32 %v291_v2, %v275_v63 }
 0x290   :  { %v295_v6 = vmul.f32 %v392_v4, %v293_v3 }
 0x292   :  { %v305_v7 = vsub.f32 %v295_v6, %v304_v5 }
 0x294   :  { %v306_v9 = vmul.f32 20.0, %v305_v7 }
 0x296   :  { %v308_v10 = vsel %vm307_vm3, %v306_v9, -inf  ;;  %v320_v11 = vmul.f32 %v334_v1, %v306_v9 }
 0x297   :  { %309 = vmax.xlane.f32.xlu0 %v308_v10 }
 0x298   :  { %v321_v12 = vsel %vm307_vm3, %v320_v11, 0.0 }
 0x29b   :  { %322 = vadd.xlane.f32.xlu0 %v321_v12 }
 0x324   :  { %v310_v13 = vpop.xlane.xlu0 %309 }
 0x325   :  { %v311_v14 = vsub.f32 %v306_v9, %v310_v13 }
 0x327   :  { %v312_v15 = vmul.f32 1.442695, %v311_v14 }
 0x328   :  { %v323_v21 = vpop.xlane.xlu0 %322 }
 0x329   :  { %393 = vpow2.f32 %v312_v15 }
 0x333   :  { %v394_v16 = vpop.eup %393 }
 0x334   :  { %v314_v17 = vsel %vm307_vm3, %v394_v16, 0.0 }
 0x335   :  { %315 = vadd.xlane.f32.xlu1 %v314_v17 }
 0x3c2   :  { %v316_v0 = vpop.xlane.xlu1 %315 }
 0x3c3   :  { %395 = vlog2.f32 %v316_v0 }
 0x3cd   :  { %v396_v18 = vpop.eup %395 }
 0x3ce   :  { %v318_v19 = vmul.f32 0.6931472, %v396_v18 }
 0x3d0   :  { %v319_v20 = vadd.f32 %v318_v19, %v310_v13 }
 0x3d2   :  { %v324_v22 = vsub.f32 %v319_v20, %v323_v21 }
 0x3d4   :  { %326 = vst.msk [vmem:[%s540_s4] sm:$0xff] %vm325_vm4, %v324_v22 }

</bundles_post_ra>
